<compile_context>
chip_gen: v5e
topology: v5e:2x2
jax: 0.10.0
libtpu: 0.0.40
codegen_flags: <defaults>
</compile_context>

<pallas_src>
import functools

import jax
import jax.numpy as jnp
import numpy as np
from jax.experimental import pallas as pl
from jax.experimental.pallas import tpu as pltpu


def mha_kernel(x_ref, wqkv_ref, wot_ref, bqkv_ref, bo_ref, *rest,
               num_heads, d_head, compute_dtype, need_weights, approx_reciprocal):
    if need_weights:
        out_ref, attn_ref, qkv_sc, ctx_sc = rest
    else:
        out_ref, qkv_sc, ctx_sc = rest
        attn_ref = None

    Bt, S, E = x_ref.shape
    H, D = num_heads, d_head
    R = Bt * S
    h = pl.program_id(1)

    # ---- fused QKV projection, once per batch block (h == 0) ------------------------
    # One (R, E) @ (E, 3E) MXU matmul (softmax scale already folded into the Q columns
    # and bias by the wrapper).  Results are scattered once (static lane slices) into a
    # head-major scratch so every later per-head access is a cheap leading-axis index.
    @pl.when(h == 0)
    def _():
        x2d = x_ref[...].reshape(R, E).astype(compute_dtype)
        qkv = jnp.dot(x2d, wqkv_ref[...],
                      preferred_element_type=jnp.float32) + bqkv_ref[...]
        for hh in range(H):
            qkv_sc[hh] = qkv[:, hh * 3 * D:(hh + 1) * 3 * D].astype(compute_dtype)

    # ---- per-head attention (head = grid axis 1: only one S^2 block live at a time) --
    qkv_h = qkv_sc[h]                                    # (R, 3D), dynamic major index
    q = qkv_h[:, :D].reshape(Bt, S, D)
    k = qkv_h[:, D:2 * D].reshape(Bt, S, D)
    v = qkv_h[:, 2 * D:].reshape(Bt, S, D)

    s = jnp.einsum("bqd,bkd->bqk", q, k,
                   preferred_element_type=jnp.float32)   # (Bt, S, S)
    m = jnp.max(s, axis=-1, keepdims=True)
    e = jnp.exp(s - m)
    l = jnp.sum(e, axis=-1, keepdims=True)               # (Bt, S, 1)
    p = e * pl.reciprocal(l, approx=approx_reciprocal)   # divide only S x 1 rows
    ctx = jnp.einsum("bqk,bkd->bqd", p.astype(compute_dtype), v,
                     preferred_element_type=jnp.float32)  # (Bt, S, D)
    ctx_sc[h] = ctx.reshape(R, D).astype(compute_dtype)

    # Head-averaged attention weights accumulated into the resident output block
    # (output BlockSpec is constant across the head axis => accumulator pattern).
    if need_weights:
        p_avg = (p * (1.0 / H)).astype(attn_ref.dtype)

        @pl.when(h == 0)
        def _():
            attn_ref[...] = p_avg

        @pl.when(h > 0)
        def _():
            attn_ref[...] = attn_ref[...] + p_avg

    # ---- output projection, once per batch block (last head) ------------------------
    # Lane-concat of the per-head contexts -> one (R, E) @ (E, E) matmul with a full
    # contracting dimension instead of H shallow K=D matmuls.
    @pl.when(h == H - 1)
    def _():
        ctx_all = jnp.concatenate([ctx_sc[hh] for hh in range(H)], axis=-1)  # (R, E)
        out2d = jnp.dot(ctx_all, wot_ref[...],
                        preferred_element_type=jnp.float32) + bo_ref[...]
        out_ref[...] = out2d.reshape(Bt, S, E).astype(out_ref.dtype)


def _device_tensorcores():
    # v7x has 2 TensorCores per chip; v5e/v6e have 1 (megacore sharding is a no-op).
    try:
        kind = jax.devices()[0].device_kind.lower()
        if "v7" in kind or "7x" in kind:
            return 2
    except Exception:
        pass
    return 1


def _vmem_capacity_bytes():
    try:
        return int(pltpu.get_tpu_info().vmem_capacity_bytes)
    except Exception:
        return 64 * 1024 * 1024   # conservative fallback (v7x per-TC VMEM)


def _per_step_vmem_bytes(batch_block, S, E, H, D, x_isz, w_isz, c_isz,
                         need_weights, a_isz, single_buffer_weights):
    """Rough per-grid-step VMEM footprint (double-buffered tiles + scratch + temps)."""
    R = batch_block * S
    total = 0
    total += 2 * R * E * x_isz                               # x block (double-buffered)
    total += 2 * R * E * 4                                   # attn_output block
    if need_weights:
        total += 2 * batch_block * S * S * a_isz             # attn_weights block
    wbuf = 1 if single_buffer_weights else 2
    total += wbuf * (3 * E * E + E * E + 4 * E) * w_isz      # weights + biases
    total += H * R * 4 * D * c_isz                           # qkv + ctx head scratch
    total += 3 * batch_block * S * S * 4                     # s / e / p (one head)
    total += R * 3 * E * 4 + 4 * R * D * 4                   # projection + q/k/v temps
    return total


def multihead_self_attention(x, wq, wk, wv, wo, bq, bk, bv, bo, *, num_heads,
                             batch_block=None, compute_dtype=jnp.float32,
                             need_weights=True, weights_dtype=jnp.float32,
                             approx_reciprocal=False, out_dtype=jnp.float32):
    B, S, E = x.shape
    assert E % num_heads == 0
    H = num_heads
    D = E // H
    scale = 1.0 / float(np.sqrt(D))

    # --- wrapper-side layout plumbing (done once, not per grid step) -----------------
    # Fused, pre-transposed QKV weight with head-contiguous column groups
    # [Wq_h | Wk_h | Wv_h]; the softmax scale is folded into the Q columns and bias.
    w_parts, b_parts = [], []
    for h in range(H):
        sl = slice(h * D, (h + 1) * D)
        w_parts += [(wq[sl] * scale).T, wk[sl].T, wv[sl].T]
        b_parts += [bq[..., sl] * scale, bk[..., sl], bv[..., sl]]
    w_qkv = jnp.concatenate(w_parts, axis=1)                 # (E, 3E), head-major cols
    b_qkv = jnp.concatenate(b_parts, axis=-1)                # (1, 3E), head-major cols
    wo_t = wo.T                                              # (E, E)
    if compute_dtype != jnp.float32:
        # Feed the MXU reduced-precision operands straight from HBM (halves DMA/VMEM);
        # softmax + accumulation stay f32 in the kernel.
        x = x.astype(compute_dtype)
        w_qkv = w_qkv.astype(compute_dtype)
        wo_t = wo_t.astype(compute_dtype)

    # --- batch tiling -----------------------------------------------------------------
    num_tc = _device_tensorcores()
    if batch_block is None:
        # 256 MXU rows/matmul for bf16 (v6e/v7x 2x256^2), 128 for f32.
        rows_target = 256 if compute_dtype != jnp.float32 else 128
        batch_block = max(1, min(B, max(1, rows_target // max(S, 1))))
        if num_tc > 1 and B >= num_tc:
            # Keep >= num_tc batch grid steps so the "parallel" axis can feed both TCs.
            batch_block = min(batch_block, max(1, B // num_tc))

    # Fit the per-step footprint into this generation's VMEM (v7x: 64 MiB physical).
    physical = _vmem_capacity_bytes()
    budget = int(0.85 * physical)
    x_isz = jnp.dtype(x.dtype).itemsize
    w_isz = jnp.dtype(w_qkv.dtype).itemsize
    c_isz = jnp.dtype(compute_dtype).itemsize
    a_isz = jnp.dtype(weights_dtype).itemsize

    def est(bb, single_buffer_weights):
        return _per_step_vmem_bytes(bb, S, E, H, D, x_isz, w_isz, c_isz,
                                    need_weights, a_isz, single_buffer_weights)

    while batch_block > 1 and est(batch_block, True) > budget:
        batch_block = max(1, batch_block // 2)
    while B % batch_block:
        batch_block -= 1
    grid = (B // batch_block, H)   # reduction (head) axis last

    vmem_limit = int(min(physical, max(32 * 1024 * 1024,
                                       2 * est(batch_block, False))))

    kernel = functools.partial(mha_kernel, num_heads=H, d_head=D,
                               compute_dtype=compute_dtype, need_weights=need_weights,
                               approx_reciprocal=approx_reciprocal)

    R = batch_block * S
    out_shapes = [jax.ShapeDtypeStruct((B, S, E), out_dtype)]
    out_specs = [pl.BlockSpec((batch_block, S, E), lambda b, h: (b, 0, 0))]
    if need_weights:
        out_shapes.append(jax.ShapeDtypeStruct((B, S, S), weights_dtype))
        out_specs.append(pl.BlockSpec((batch_block, S, S), lambda b, h: (b, 0, 0)))

    scratch_shapes = [
        pltpu.VMEM((H, R, 3 * D), compute_dtype),   # per-head packed q|k|v
        pltpu.VMEM((H, R, D), compute_dtype),       # per-head context
    ]

    def build(single_buffer_weights):
        def const_spec(shape):
            if single_buffer_weights:
                # Constant-index blocks are revisited every step; single-buffering
                # halves their VMEM residency with no pipelining benefit lost.
                return pl.BlockSpec(shape, lambda b, h: (0, 0),
                                    pipeline_mode=pl.Buffered(1))
            return pl.BlockSpec(shape, lambda b, h: (0, 0))

        return pl.pallas_call(
            kernel,
            out_shape=tuple(out_shapes),
            grid=grid,
            in_specs=[
                pl.BlockSpec((batch_block, S, E), lambda b, h: (b, 0, 0)),  # x
                const_spec((E, 3 * E)),                                     # W_qkv^T
                const_spec((E, E)),                                         # W_o^T
                const_spec((1, 3 * E)),                                     # b_qkv
                const_spec((1, E)),                                         # b_o
            ],
            out_specs=tuple(out_specs),
            scratch_shapes=scratch_shapes,
            compiler_params=pltpu.CompilerParams(
                dimension_semantics=("parallel", "arbitrary"),
                vmem_limit_bytes=vmem_limit),
        )

    try:
        outs = build(True)(x, w_qkv, wo_t, b_qkv, bo)
    except Exception:
        # Some jax versions reject pipeline_mode on pallas_call BlockSpecs; fall back
        # to default double-buffered weight blocks (identical math).
        outs = build(False)(x, w_qkv, wo_t, b_qkv, bo)

    if need_weights:
        return outs[0], outs[1]
    return outs[0], None


def reference_mha(x, wq, wk, wv, wo, bq, bk, bv, bo, *, num_heads):
    """Pure-JAX reference matching nn.MultiheadAttention forward (batch-first)."""
    B, S, E = x.shape
    D = E // num_heads
    q = x @ wq.T + bq[0]
    k = x @ wk.T + bk[0]
    v = x @ wv.T + bv[0]
    q = q.reshape(B, S, num_heads, D).transpose(0, 2, 1, 3) / jnp.sqrt(D)
    k = k.reshape(B, S, num_heads, D).transpose(0, 2, 1, 3)
    v = v.reshape(B, S, num_heads, D).transpose(0, 2, 1, 3)
    scores = jnp.einsum("bhqd,bhkd->bhqk", q, k)
    p = jax.nn.softmax(scores, axis=-1)
    ctx = jnp.einsum("bhqk,bhkd->bhqd", p, v)
    ctx = ctx.transpose(0, 2, 1, 3).reshape(B, S, E)
    out = ctx @ wo.T + bo[0]
    return out, p.mean(axis=1)


if __name__ == "__main__":
    # Small shapes consistent with the module's forward: (batch, seq, embed_dim)
    B, S, E = 2, 8, 32
    NUM_HEADS = 2

    key = jax.random.PRNGKey(0)
    kx, kq, kk, kv, ko, kbq, kbk, kbv, kbo = jax.random.split(key, 9)

    # Deterministic synthetic parameters, shapes matching nn.MultiheadAttention:
    # in_proj (3E, E) split into Wq/Wk/Wv, out_proj (E, E).
    a = 1.0 / np.sqrt(E)
    x = jax.random.normal(kx, (B, S, E), dtype=jnp.float32)
    wq = jax.random.uniform(kq, (E, E), jnp.float32, -a, a)
    wk = jax.random.uniform(kk, (E, E), jnp.float32, -a, a)
    wv = jax.random.uniform(kv, (E, E), jnp.float32, -a, a)
    wo = jax.random.uniform(ko, (E, E), jnp.float32, -a, a)
    bq = 0.1 * jax.random.normal(kbq, (1, E), dtype=jnp.float32)
    bk = 0.1 * jax.random.normal(kbk, (1, E), dtype=jnp.float32)
    bv = 0.1 * jax.random.normal(kbv, (1, E), dtype=jnp.float32)
    bo = 0.1 * jax.random.normal(kbo, (1, E), dtype=jnp.float32)

    # f32 compute + exact reciprocal keeps the 1e-5 check; on v6e/v7x production shapes
    # pass compute_dtype=jnp.bfloat16 (and approx_reciprocal=True) for MXU/VMEM wins.
    attn_out, attn_w = multihead_self_attention(
        x, wq, wk, wv, wo, bq, bk, bv, bo, num_heads=NUM_HEADS,
        compute_dtype=jnp.float32, need_weights=True,
        weights_dtype=jnp.float32, approx_reciprocal=False)
    attn_out = jax.block_until_ready(attn_out)
    attn_w = jax.block_until_ready(attn_w)

    ref_out, ref_w = reference_mha(
        x, wq, wk, wv, wo, bq, bk, bv, bo, num_heads=NUM_HEADS)
    np.testing.assert_allclose(np.asarray(attn_out), np.asarray(ref_out),
                               rtol=1e-5, atol=1e-5)
    np.testing.assert_allclose(np.asarray(attn_w), np.asarray(ref_w),
                               rtol=1e-5, atol=1e-5)

    print("KERNEL_OK")
</pallas_src>

<mosaic_0001>
module attributes {stable_mosaic.version = 11 : i64} {
  func.func @mha_kernel(%arg0: i32, %arg1: i32, %arg2: memref<2x8x32xf32, #tpu.memory_space<vmem>>, %arg3: memref<32x96xf32, #tpu.memory_space<vmem>>, %arg4: memref<32x32xf32, #tpu.memory_space<vmem>>, %arg5: memref<1x96xf32, #tpu.memory_space<vmem>>, %arg6: memref<1x32xf32, #tpu.memory_space<vmem>>, %arg7: memref<2x8x32xf32, #tpu.memory_space<vmem>>, %arg8: memref<2x8x8xf32, #tpu.memory_space<vmem>>, %arg9: memref<2x16x48xf32, #tpu.memory_space<vmem>>, %arg10: memref<2x16x16xf32, #tpu.memory_space<vmem>>) attributes {dimension_semantics = [#tpu.dimension_semantics<parallel>, #tpu.dimension_semantics<arbitrary>], iteration_bounds = array<i64: 1, 2>, scalar_prefetch = 0 : i64, scratch_operands = 2 : i64, tpu.core_type = #tpu.core_type<tc>, window_params = [{transform_indices = @transform_0, window_bounds = array<i64: 2, 8, 32>}, {pipeline_mode = #tpu.pipeline_mode<synchronous>, transform_indices = @transform_1, window_bounds = array<i64: 32, 96>}, {pipeline_mode = #tpu.pipeline_mode<synchronous>, transform_indices = @transform_2, window_bounds = array<i64: 32, 32>}, {pipeline_mode = #tpu.pipeline_mode<synchronous>, transform_indices = @transform_3, window_bounds = array<i64: 1, 96>}, {pipeline_mode = #tpu.pipeline_mode<synchronous>, transform_indices = @transform_4, window_bounds = array<i64: 1, 32>}, {transform_indices = @transform_5, window_bounds = array<i64: 2, 8, 32>}, {transform_indices = @transform_6, window_bounds = array<i64: 2, 8, 8>}]} {
    %c0_i32 = arith.constant 0 : i32
    %0 = arith.cmpi eq, %arg1, %c0_i32 : i32
    %1 = arith.extui %0 : i1 to i32
    %c0_i32_0 = arith.constant 0 : i32
    %2 = arith.cmpi ne, %1, %c0_i32_0 : i32
    scf.if %2 {
      %c0_13 = arith.constant 0 : index
      %c0_14 = arith.constant 0 : index
      %c0_15 = arith.constant 0 : index
      %40 = vector.load %arg2[%c0_13, %c0_14, %c0_15] : memref<2x8x32xf32, #tpu.memory_space<vmem>>, vector<2x8x32xf32>
      %41 = vector.shape_cast %40 : vector<2x8x32xf32> to vector<16x32xf32>
      %c0_16 = arith.constant 0 : index
      %c0_17 = arith.constant 0 : index
      %42 = vector.load %arg3[%c0_16, %c0_17] : memref<32x96xf32, #tpu.memory_space<vmem>>, vector<32x96xf32>
      %cst_18 = arith.constant dense<0.000000e+00> : vector<16x96xf32>
      %43 = tpu.matmul %41, %42, %cst_18 {dimension_numbers = #tpu.dot_dimension_numbers<[1], [0], [0], [1], [0, 0, 1, 1], [], []>} : vector<16x32xf32>, vector<32x96xf32>, vector<16x96xf32> -> vector<16x96xf32>
      %c0_19 = arith.constant 0 : index
      %c0_20 = arith.constant 0 : index
      %44 = vector.load %arg5[%c0_19, %c0_20] : memref<1x96xf32, #tpu.memory_space<vmem>>, vector<1x96xf32>
      %45 = vector.broadcast %44 : vector<1x96xf32> to vector<16x96xf32>
      %46 = arith.addf %43, %45 : vector<16x96xf32>
      %47 = vector.extract_strided_slice %46 {offsets = [0, 0], sizes = [16, 48], strides = [1, 1]} : vector<16x96xf32> to vector<16x48xf32>
      %c0_21 = arith.constant 0 : index
      %c0_22 = arith.constant 0 : index
      %c0_23 = arith.constant 0 : index
      %48 = vector.load %arg9[%c0_21, %c0_22, %c0_23] : memref<2x16x48xf32, #tpu.memory_space<vmem>>, vector<1x16x48xf32>
      %49 = vector.shape_cast %48 : vector<1x16x48xf32> to vector<16x48xf32>
      %50 = vector.shape_cast %47 : vector<16x48xf32> to vector<1x16x48xf32>
      tpu.vector_store %arg9[%c0_21, %c0_22, %c0_23], %50 {strides = array<i32>} : memref<2x16x48xf32, #tpu.memory_space<vmem>>, vector<1x16x48xf32>,
      %51 = vector.extract_strided_slice %46 {offsets = [0, 48], sizes = [16, 48], strides = [1, 1]} : vector<16x96xf32> to vector<16x48xf32>
      %c1 = arith.constant 1 : index
      %c0_24 = arith.constant 0 : index
      %c0_25 = arith.constant 0 : index
      %52 = vector.load %arg9[%c1, %c0_24, %c0_25] : memref<2x16x48xf32, #tpu.memory_space<vmem>>, vector<1x16x48xf32>
      %53 = vector.shape_cast %52 : vector<1x16x48xf32> to vector<16x48xf32>
      %54 = vector.shape_cast %51 : vector<16x48xf32> to vector<1x16x48xf32>
      tpu.vector_store %arg9[%c1, %c0_24, %c0_25], %54 {strides = array<i32>} : memref<2x16x48xf32, #tpu.memory_space<vmem>>, vector<1x16x48xf32>,
    } else {
    }
    %3 = arith.index_cast %arg1 : i32 to index
    %c0 = arith.constant 0 : index
    %c0_1 = arith.constant 0 : index
    %4 = vector.load %arg9[%3, %c0, %c0_1] : memref<2x16x48xf32, #tpu.memory_space<vmem>>, vector<1x16x48xf32>
    %5 = vector.shape_cast %4 : vector<1x16x48xf32> to vector<16x48xf32>
    %6 = vector.extract_strided_slice %5 {offsets = [0, 0], sizes = [16, 16], strides = [1, 1]} : vector<16x48xf32> to vector<16x16xf32>
    %7 = vector.shape_cast %6 : vector<16x16xf32> to vector<2x8x16xf32>
    %8 = vector.extract_strided_slice %5 {offsets = [0, 16], sizes = [16, 16], strides = [1, 1]} : vector<16x48xf32> to vector<16x16xf32>
    %9 = vector.shape_cast %8 : vector<16x16xf32> to vector<2x8x16xf32>
    %10 = vector.extract_strided_slice %5 {offsets = [0, 32], sizes = [16, 16], strides = [1, 1]} : vector<16x48xf32> to vector<16x16xf32>
    %11 = vector.shape_cast %10 : vector<16x16xf32> to vector<2x8x16xf32>
    "tpu.trace_start"() <{level = 10 : i32, message = "bqd,bkd->bqk"}> : () -> ()
    %cst = arith.constant dense<0.000000e+00> : vector<2x8x8xf32>
    %12 = tpu.matmul %7, %9, %cst {dimension_numbers = #tpu.dot_dimension_numbers<[2], [2], [1], [1], [0, 0, 0, 1, 1, 1], [0], [0]>} : vector<2x8x16xf32>, vector<2x8x16xf32>, vector<2x8x8xf32> -> vector<2x8x8xf32>
    "tpu.trace_stop"() : () -> ()
    %cst_2 = arith.constant dense<0xFF800000> : vector<2x8xf32>
    %13 = vector.multi_reduction <maximumf>, %12, %cst_2 [2] : vector<2x8x8xf32> to vector<2x8xf32>
    %14 = vector.shape_cast %13 : vector<2x8xf32> to vector<2x8x1xf32>
    %15 = vector.broadcast %14 : vector<2x8x1xf32> to vector<2x8x8xf32>
    %16 = arith.subf %12, %15 : vector<2x8x8xf32>
    %17 = math.exp %16 : vector<2x8x8xf32>
    %cst_3 = arith.constant dense<0.000000e+00> : vector<2x8xf32>
    %18 = vector.multi_reduction <add>, %17, %cst_3 [2] : vector<2x8x8xf32> to vector<2x8xf32>
    %19 = vector.shape_cast %18 : vector<2x8xf32> to vector<2x8x1xf32>
    %20 = tpu.reciprocal %19 : vector<2x8x1xf32> -> vector<2x8x1xf32>
    %21 = vector.broadcast %20 : vector<2x8x1xf32> to vector<2x8x8xf32>
    %22 = arith.mulf %17, %21 : vector<2x8x8xf32>
    "tpu.trace_start"() <{level = 10 : i32, message = "bqk,bkd->bqd"}> : () -> ()
    %cst_4 = arith.constant dense<0.000000e+00> : vector<2x8x16xf32>
    %23 = tpu.matmul %22, %11, %cst_4 {dimension_numbers = #tpu.dot_dimension_numbers<[2], [1], [1], [2], [0, 0, 0, 1, 1, 2], [0], [0]>} : vector<2x8x8xf32>, vector<2x8x16xf32>, vector<2x8x16xf32> -> vector<2x8x16xf32>
    "tpu.trace_stop"() : () -> ()
    %24 = vector.shape_cast %23 : vector<2x8x16xf32> to vector<16x16xf32>
    %25 = arith.index_cast %arg1 : i32 to index
    %c0_5 = arith.constant 0 : index
    %c0_6 = arith.constant 0 : index
    %26 = vector.load %arg10[%25, %c0_5, %c0_6] : memref<2x16x16xf32, #tpu.memory_space<vmem>>, vector<1x16x16xf32>
    %27 = vector.shape_cast %26 : vector<1x16x16xf32> to vector<16x16xf32>
    %28 = vector.shape_cast %24 : vector<16x16xf32> to vector<1x16x16xf32>
    tpu.vector_store %arg10[%25, %c0_5, %c0_6], %28 {strides = array<i32>} : memref<2x16x16xf32, #tpu.memory_space<vmem>>, vector<1x16x16xf32>,
    %cst_7 = arith.constant 5.000000e-01 : f32
    %29 = vector.broadcast %cst_7 : f32 to vector<2x8x8xf32>
    %30 = arith.mulf %22, %29 : vector<2x8x8xf32>
    %c0_i32_8 = arith.constant 0 : i32
    %31 = arith.cmpi eq, %arg1, %c0_i32_8 : i32
    %32 = arith.extui %31 : i1 to i32
    %c0_i32_9 = arith.constant 0 : i32
    %33 = arith.cmpi ne, %32, %c0_i32_9 : i32
    scf.if %33 {
      %c0_13 = arith.constant 0 : index
      %c0_14 = arith.constant 0 : index
      %c0_15 = arith.constant 0 : index
      %40 = vector.load %arg8[%c0_13, %c0_14, %c0_15] : memref<2x8x8xf32, #tpu.memory_space<vmem>>, vector<2x8x8xf32>
      tpu.vector_store %arg8[%c0_13, %c0_14, %c0_15], %30 {strides = array<i32>} : memref<2x8x8xf32, #tpu.memory_space<vmem>>, vector<2x8x8xf32>,
    } else {
    }
    %c0_i32_10 = arith.constant 0 : i32
    %34 = arith.cmpi sgt, %arg1, %c0_i32_10 : i32
    %35 = arith.extui %34 : i1 to i32
    %c0_i32_11 = arith.constant 0 : i32
    %36 = arith.cmpi ne, %35, %c0_i32_11 : i32
    scf.if %36 {
      %c0_13 = arith.constant 0 : index
      %c0_14 = arith.constant 0 : index
      %c0_15 = arith.constant 0 : index
      %40 = vector.load %arg8[%c0_13, %c0_14, %c0_15] : memref<2x8x8xf32, #tpu.memory_space<vmem>>, vector<2x8x8xf32>
      %41 = arith.addf %40, %30 : vector<2x8x8xf32>
      %c0_16 = arith.constant 0 : index
      %c0_17 = arith.constant 0 : index
      %c0_18 = arith.constant 0 : index
      %42 = vector.load %arg8[%c0_16, %c0_17, %c0_18] : memref<2x8x8xf32, #tpu.memory_space<vmem>>, vector<2x8x8xf32>
      tpu.vector_store %arg8[%c0_16, %c0_17, %c0_18], %41 {strides = array<i32>} : memref<2x8x8xf32, #tpu.memory_space<vmem>>, vector<2x8x8xf32>,
    } else {
    }
    %c1_i32 = arith.constant 1 : i32
    %37 = arith.cmpi eq, %arg1, %c1_i32 : i32
    %38 = arith.extui %37 : i1 to i32
    %c0_i32_12 = arith.constant 0 : i32
    %39 = arith.cmpi ne, %38, %c0_i32_12 : i32
    scf.if %39 {
      %c0_13 = arith.constant 0 : index
      %c0_14 = arith.constant 0 : index
      %c0_15 = arith.constant 0 : index
      %40 = vector.load %arg10[%c0_13, %c0_14, %c0_15] : memref<2x16x16xf32, #tpu.memory_space<vmem>>, vector<1x16x16xf32>
      %41 = vector.shape_cast %40 : vector<1x16x16xf32> to vector<16x16xf32>
      %c1 = arith.constant 1 : index
      %c0_16 = arith.constant 0 : index
      %c0_17 = arith.constant 0 : index
      %42 = vector.load %arg10[%c1, %c0_16, %c0_17] : memref<2x16x16xf32, #tpu.memory_space<vmem>>, vector<1x16x16xf32>
      %43 = vector.shape_cast %42 : vector<1x16x16xf32> to vector<16x16xf32>
      %44 = tpu.concatenate %41, %43 in 1 : vector<16x16xf32>, vector<16x16xf32> -> vector<16x32xf32>
      %c0_18 = arith.constant 0 : index
      %c0_19 = arith.constant 0 : index
      %45 = vector.load %arg4[%c0_18, %c0_19] : memref<32x32xf32, #tpu.memory_space<vmem>>, vector<32x32xf32>
      %cst_20 = arith.constant dense<0.000000e+00> : vector<16x32xf32>
      %46 = tpu.matmul %44, %45, %cst_20 {dimension_numbers = #tpu.dot_dimension_numbers<[1], [0], [0], [1], [0, 0, 1, 1], [], []>} : vector<16x32xf32>, vector<32x32xf32>, vector<16x32xf32> -> vector<16x32xf32>
      %c0_21 = arith.constant 0 : index
      %c0_22 = arith.constant 0 : index
      %47 = vector.load %arg6[%c0_21, %c0_22] : memref<1x32xf32, #tpu.memory_space<vmem>>, vector<1x32xf32>
      %48 = vector.broadcast %47 : vector<1x32xf32> to vector<16x32xf32>
      %49 = arith.addf %46, %48 : vector<16x32xf32>
      %50 = vector.shape_cast %49 : vector<16x32xf32> to vector<2x8x32xf32>
      %c0_23 = arith.constant 0 : index
      %c0_24 = arith.constant 0 : index
      %c0_25 = arith.constant 0 : index
      %51 = vector.load %arg7[%c0_23, %c0_24, %c0_25] : memref<2x8x32xf32, #tpu.memory_space<vmem>>, vector<2x8x32xf32>
      tpu.vector_store %arg7[%c0_23, %c0_24, %c0_25], %50 {strides = array<i32>} : memref<2x8x32xf32, #tpu.memory_space<vmem>>, vector<2x8x32xf32>,
    } else {
    }
    return
  }
  func.func @transform_0(%arg0: i32, %arg1: i32) -> (i32, i32, i32) {
    %c0_i32 = arith.constant 0 : i32
    %c0_i32_0 = arith.constant 0 : i32
    %c0_i32_1 = arith.constant 0 : i32
    return %arg0, %c0_i32, %c0_i32_0 : i32, i32, i32
  }
  func.func @transform_1(%arg0: i32, %arg1: i32) -> (i32, i32) {
    %c0_i32 = arith.constant 0 : i32
    %c0_i32_0 = arith.constant 0 : i32
    %c0_i32_1 = arith.constant 0 : i32
    return %c0_i32, %c0_i32_0 : i32, i32
  }
  func.func @transform_2(%arg0: i32, %arg1: i32) -> (i32, i32) {
    %c0_i32 = arith.constant 0 : i32
    %c0_i32_0 = arith.constant 0 : i32
    %c0_i32_1 = arith.constant 0 : i32
    return %c0_i32, %c0_i32_0 : i32, i32
  }
  func.func @transform_3(%arg0: i32, %arg1: i32) -> (i32, i32) {
    %c0_i32 = arith.constant 0 : i32
    %c0_i32_0 = arith.constant 0 : i32
    %c0_i32_1 = arith.constant 0 : i32
    return %c0_i32, %c0_i32_0 : i32, i32
  }
  func.func @transform_4(%arg0: i32, %arg1: i32) -> (i32, i32) {
    %c0_i32 = arith.constant 0 : i32
    %c0_i32_0 = arith.constant 0 : i32
    %c0_i32_1 = arith.constant 0 : i32
    return %c0_i32, %c0_i32_0 : i32, i32
  }
  func.func @transform_5(%arg0: i32, %arg1: i32) -> (i32, i32, i32) {
    %c0_i32 = arith.constant 0 : i32
    %c0_i32_0 = arith.constant 0 : i32
    %c0_i32_1 = arith.constant 0 : i32
    return %arg0, %c0_i32, %c0_i32_0 : i32, i32, i32
  }
  func.func @transform_6(%arg0: i32, %arg1: i32) -> (i32, i32, i32) {
    %c0_i32 = arith.constant 0 : i32
    %c0_i32_0 = arith.constant 0 : i32
    %c0_i32_1 = arith.constant 0 : i32
    return %arg0, %c0_i32, %c0_i32_0 : i32, i32, i32
  }
}

module attributes {stable_mosaic.version = 11 : i64} {
  func.func @mha_kernel(%arg0: i32, %arg1: i32, %arg2: memref<2x8x32xf32, #tpu.memory_space<vmem>>, %arg3: memref<32x96xf32, #tpu.memory_space<vmem>>, %arg4: memref<32x32xf32, #tpu.memory_space<vmem>>, %arg5: memref<1x96xf32, #tpu.memory_space<vmem>>, %arg6: memref<1x32xf32, #tpu.memory_space<vmem>>, %arg7: memref<2x8x32xf32, #tpu.memory_space<vmem>>, %arg8: memref<2x8x8xf32, #tpu.memory_space<vmem>>, %arg9: memref<2x16x48xf32, #tpu.memory_space<vmem>>, %arg10: memref<2x16x16xf32, #tpu.memory_space<vmem>>) attributes {dimension_semantics = [#tpu.dimension_semantics<parallel>, #tpu.dimension_semantics<arbitrary>], iteration_bounds = array<i64: 1, 2>, scalar_prefetch = 0 : i64, scratch_operands = 2 : i64, tpu.core_type = #tpu.core_type<tc>, window_params = [{transform_indices = @transform_0, window_bounds = array<i64: 2, 8, 32>}, {pipeline_mode = #tpu.pipeline_mode<synchronous>, transform_indices = @transform_1, window_bounds = array<i64: 32, 96>}, {pipeline_mode = #tpu.pipeline_mode<synchronous>, transform_indices = @transform_2, window_bounds = array<i64: 32, 32>}, {pipeline_mode = #tpu.pipeline_mode<synchronous>, transform_indices = @transform_3, window_bounds = array<i64: 1, 96>}, {pipeline_mode = #tpu.pipeline_mode<synchronous>, transform_indices = @transform_4, window_bounds = array<i64: 1, 32>}, {transform_indices = @transform_5, window_bounds = array<i64: 2, 8, 32>}, {transform_indices = @transform_6, window_bounds = array<i64: 2, 8, 8>}]} {
    %c0_i32 = arith.constant 0 : i32
    %0 = arith.cmpi eq, %arg1, %c0_i32 : i32
    %1 = arith.extui %0 : i1 to i32
    %c0_i32_0 = arith.constant 0 : i32
    %2 = arith.cmpi ne, %1, %c0_i32_0 : i32
    scf.if %2 {
      %c0_13 = arith.constant 0 : index
      %c0_14 = arith.constant 0 : index
      %c0_15 = arith.constant 0 : index
      %40 = vector.load %arg2[%c0_13, %c0_14, %c0_15] : memref<2x8x32xf32, #tpu.memory_space<vmem>>, vector<2x8x32xf32>
      %41 = vector.shape_cast %40 : vector<2x8x32xf32> to vector<16x32xf32>
      %c0_16 = arith.constant 0 : index
      %c0_17 = arith.constant 0 : index
      %42 = vector.load %arg3[%c0_16, %c0_17] : memref<32x96xf32, #tpu.memory_space<vmem>>, vector<32x96xf32>
      %cst_18 = arith.constant dense<0.000000e+00> : vector<16x96xf32>
      %43 = tpu.matmul %41, %42, %cst_18 {dimension_numbers = #tpu.dot_dimension_numbers<[1], [0], [0], [1], [0, 0, 1, 1], [], []>} : vector<16x32xf32>, vector<32x96xf32>, vector<16x96xf32> -> vector<16x96xf32>
      %c0_19 = arith.constant 0 : index
      %c0_20 = arith.constant 0 : index
      %44 = vector.load %arg5[%c0_19, %c0_20] : memref<1x96xf32, #tpu.memory_space<vmem>>, vector<1x96xf32>
      %45 = vector.broadcast %44 : vector<1x96xf32> to vector<16x96xf32>
      %46 = arith.addf %43, %45 : vector<16x96xf32>
      %47 = vector.extract_strided_slice %46 {offsets = [0, 0], sizes = [16, 48], strides = [1, 1]} : vector<16x96xf32> to vector<16x48xf32>
      %c0_21 = arith.constant 0 : index
      %c0_22 = arith.constant 0 : index
      %c0_23 = arith.constant 0 : index
      %48 = vector.load %arg9[%c0_21, %c0_22, %c0_23] : memref<2x16x48xf32, #tpu.memory_space<vmem>>, vector<1x16x48xf32>
      %49 = vector.shape_cast %48 : vector<1x16x48xf32> to vector<16x48xf32>
      %50 = vector.shape_cast %47 : vector<16x48xf32> to vector<1x16x48xf32>
      tpu.vector_store %arg9[%c0_21, %c0_22, %c0_23], %50 {strides = array<i32>} : memref<2x16x48xf32, #tpu.memory_space<vmem>>, vector<1x16x48xf32>,
      %51 = vector.extract_strided_slice %46 {offsets = [0, 48], sizes = [16, 48], strides = [1, 1]} : vector<16x96xf32> to vector<16x48xf32>
      %c1 = arith.constant 1 : index
      %c0_24 = arith.constant 0 : index
      %c0_25 = arith.constant 0 : index
      %52 = vector.load %arg9[%c1, %c0_24, %c0_25] : memref<2x16x48xf32, #tpu.memory_space<vmem>>, vector<1x16x48xf32>
      %53 = vector.shape_cast %52 : vector<1x16x48xf32> to vector<16x48xf32>
      %54 = vector.shape_cast %51 : vector<16x48xf32> to vector<1x16x48xf32>
      tpu.vector_store %arg9[%c1, %c0_24, %c0_25], %54 {strides = array<i32>} : memref<2x16x48xf32, #tpu.memory_space<vmem>>, vector<1x16x48xf32>,
    } else {
    }
    %3 = arith.index_cast %arg1 : i32 to index
    %c0 = arith.constant 0 : index
    %c0_1 = arith.constant 0 : index
    %4 = vector.load %arg9[%3, %c0, %c0_1] : memref<2x16x48xf32, #tpu.memory_space<vmem>>, vector<1x16x48xf32>
    %5 = vector.shape_cast %4 : vector<1x16x48xf32> to vector<16x48xf32>
    %6 = vector.extract_strided_slice %5 {offsets = [0, 0], sizes = [16, 16], strides = [1, 1]} : vector<16x48xf32> to vector<16x16xf32>
    %7 = vector.shape_cast %6 : vector<16x16xf32> to vector<2x8x16xf32>
    %8 = vector.extract_strided_slice %5 {offsets = [0, 16], sizes = [16, 16], strides = [1, 1]} : vector<16x48xf32> to vector<16x16xf32>
    %9 = vector.shape_cast %8 : vector<16x16xf32> to vector<2x8x16xf32>
    %10 = vector.extract_strided_slice %5 {offsets = [0, 32], sizes = [16, 16], strides = [1, 1]} : vector<16x48xf32> to vector<16x16xf32>
    %11 = vector.shape_cast %10 : vector<16x16xf32> to vector<2x8x16xf32>
    "tpu.trace_start"() <{level = 10 : i32, message = "bqd,bkd->bqk"}> : () -> ()
    %cst = arith.constant dense<0.000000e+00> : vector<2x8x8xf32>
    %12 = tpu.matmul %7, %9, %cst {dimension_numbers = #tpu.dot_dimension_numbers<[2], [2], [1], [1], [0, 0, 0, 1, 1, 1], [0], [0]>} : vector<2x8x16xf32>, vector<2x8x16xf32>, vector<2x8x8xf32> -> vector<2x8x8xf32>
    "tpu.trace_stop"() : () -> ()
    %cst_2 = arith.constant dense<0xFF800000> : vector<2x8xf32>
    %13 = vector.multi_reduction <maximumf>, %12, %cst_2 [2] : vector<2x8x8xf32> to vector<2x8xf32>
    %14 = vector.shape_cast %13 : vector<2x8xf32> to vector<2x8x1xf32>
    %15 = vector.broadcast %14 : vector<2x8x1xf32> to vector<2x8x8xf32>
    %16 = arith.subf %12, %15 : vector<2x8x8xf32>
    %17 = math.exp %16 : vector<2x8x8xf32>
    %cst_3 = arith.constant dense<0.000000e+00> : vector<2x8xf32>
    %18 = vector.multi_reduction <add>, %17, %cst_3 [2] : vector<2x8x8xf32> to vector<2x8xf32>
    %19 = vector.shape_cast %18 : vector<2x8xf32> to vector<2x8x1xf32>
    %20 = tpu.reciprocal %19 : vector<2x8x1xf32> -> vector<2x8x1xf32>
    %21 = vector.broadcast %20 : vector<2x8x1xf32> to vector<2x8x8xf32>
    %22 = arith.mulf %17, %21 : vector<2x8x8xf32>
    "tpu.trace_start"() <{level = 10 : i32, message = "bqk,bkd->bqd"}> : () -> ()
    %cst_4 = arith.constant dense<0.000000e+00> : vector<2x8x16xf32>
    %23 = tpu.matmul %22, %11, %cst_4 {dimension_numbers = #tpu.dot_dimension_numbers<[2], [1], [1], [2], [0, 0, 0, 1, 1, 2], [0], [0]>} : vector<2x8x8xf32>, vector<2x8x16xf32>, vector<2x8x16xf32> -> vector<2x8x16xf32>
    "tpu.trace_stop"() : () -> ()
    %24 = vector.shape_cast %23 : vector<2x8x16xf32> to vector<16x16xf32>
    %25 = arith.index_cast %arg1 : i32 to index
    %c0_5 = arith.constant 0 : index
    %c0_6 = arith.constant 0 : index
    %26 = vector.load %arg10[%25, %c0_5, %c0_6] : memref<2x16x16xf32, #tpu.memory_space<vmem>>, vector<1x16x16xf32>
    %27 = vector.shape_cast %26 : vector<1x16x16xf32> to vector<16x16xf32>
    %28 = vector.shape_cast %24 : vector<16x16xf32> to vector<1x16x16xf32>
    tpu.vector_store %arg10[%25, %c0_5, %c0_6], %28 {strides = array<i32>} : memref<2x16x16xf32, #tpu.memory_space<vmem>>, vector<1x16x16xf32>,
    %cst_7 = arith.constant 5.000000e-01 : f32
    %29 = vector.broadcast %cst_7 : f32 to vector<2x8x8xf32>
    %30 = arith.mulf %22, %29 : vector<2x8x8xf32>
    %c0_i32_8 = arith.constant 0 : i32
    %31 = arith.cmpi eq, %arg1, %c0_i32_8 : i32
    %32 = arith.extui %31 : i1 to i32
    %c0_i32_9 = arith.constant 0 : i32
    %33 = arith.cmpi ne, %32, %c0_i32_9 : i32
    scf.if %33 {
      %c0_13 = arith.constant 0 : index
      %c0_14 = arith.constant 0 : index
      %c0_15 = arith.constant 0 : index
      %40 = vector.load %arg8[%c0_13, %c0_14, %c0_15] : memref<2x8x8xf32, #tpu.memory_space<vmem>>, vector<2x8x8xf32>
      tpu.vector_store %arg8[%c0_13, %c0_14, %c0_15], %30 {strides = array<i32>} : memref<2x8x8xf32, #tpu.memory_space<vmem>>, vector<2x8x8xf32>,
    } else {
    }
    %c0_i32_10 = arith.constant 0 : i32
    %34 = arith.cmpi sgt, %arg1, %c0_i32_10 : i32
    %35 = arith.extui %34 : i1 to i32
    %c0_i32_11 = arith.constant 0 : i32
    %36 = arith.cmpi ne, %35, %c0_i32_11 : i32
    scf.if %36 {
      %c0_13 = arith.constant 0 : index
      %c0_14 = arith.constant 0 : index
      %c0_15 = arith.constant 0 : index
      %40 = vector.load %arg8[%c0_13, %c0_14, %c0_15] : memref<2x8x8xf32, #tpu.memory_space<vmem>>, vector<2x8x8xf32>
      %41 = arith.addf %40, %30 : vector<2x8x8xf32>
      %c0_16 = arith.constant 0 : index
      %c0_17 = arith.constant 0 : index
      %c0_18 = arith.constant 0 : index
      %42 = vector.load %arg8[%c0_16, %c0_17, %c0_18] : memref<2x8x8xf32, #tpu.memory_space<vmem>>, vector<2x8x8xf32>
      tpu.vector_store %arg8[%c0_16, %c0_17, %c0_18], %41 {strides = array<i32>} : memref<2x8x8xf32, #tpu.memory_space<vmem>>, vector<2x8x8xf32>,
    } else {
    }
    %c1_i32 = arith.constant 1 : i32
    %37 = arith.cmpi eq, %arg1, %c1_i32 : i32
    %38 = arith.extui %37 : i1 to i32
    %c0_i32_12 = arith.constant 0 : i32
    %39 = arith.cmpi ne, %38, %c0_i32_12 : i32
    scf.if %39 {
      %c0_13 = arith.constant 0 : index
      %c0_14 = arith.constant 0 : index
      %c0_15 = arith.constant 0 : index
      %40 = vector.load %arg10[%c0_13, %c0_14, %c0_15] : memref<2x16x16xf32, #tpu.memory_space<vmem>>, vector<1x16x16xf32>
      %41 = vector.shape_cast %40 : vector<1x16x16xf32> to vector<16x16xf32>
      %c1 = arith.constant 1 : index
      %c0_16 = arith.constant 0 : index
      %c0_17 = arith.constant 0 : index
      %42 = vector.load %arg10[%c1, %c0_16, %c0_17] : memref<2x16x16xf32, #tpu.memory_space<vmem>>, vector<1x16x16xf32>
      %43 = vector.shape_cast %42 : vector<1x16x16xf32> to vector<16x16xf32>
      %44 = tpu.concatenate %41, %43 in 1 : vector<16x16xf32>, vector<16x16xf32> -> vector<16x32xf32>
      %c0_18 = arith.constant 0 : index
      %c0_19 = arith.constant 0 : index
      %45 = vector.load %arg4[%c0_18, %c0_19] : memref<32x32xf32, #tpu.memory_space<vmem>>, vector<32x32xf32>
      %cst_20 = arith.constant dense<0.000000e+00> : vector<16x32xf32>
      %46 = tpu.matmul %44, %45, %cst_20 {dimension_numbers = #tpu.dot_dimension_numbers<[1], [0], [0], [1], [0, 0, 1, 1], [], []>} : vector<16x32xf32>, vector<32x32xf32>, vector<16x32xf32> -> vector<16x32xf32>
      %c0_21 = arith.constant 0 : index
      %c0_22 = arith.constant 0 : index
      %47 = vector.load %arg6[%c0_21, %c0_22] : memref<1x32xf32, #tpu.memory_space<vmem>>, vector<1x32xf32>
      %48 = vector.broadcast %47 : vector<1x32xf32> to vector<16x32xf32>
      %49 = arith.addf %46, %48 : vector<16x32xf32>
      %50 = vector.shape_cast %49 : vector<16x32xf32> to vector<2x8x32xf32>
      %c0_23 = arith.constant 0 : index
      %c0_24 = arith.constant 0 : index
      %c0_25 = arith.constant 0 : index
      %51 = vector.load %arg7[%c0_23, %c0_24, %c0_25] : memref<2x8x32xf32, #tpu.memory_space<vmem>>, vector<2x8x32xf32>
      tpu.vector_store %arg7[%c0_23, %c0_24, %c0_25], %50 {strides = array<i32>} : memref<2x8x32xf32, #tpu.memory_space<vmem>>, vector<2x8x32xf32>,
    } else {
    }
    return
  }
  func.func @transform_0(%arg0: i32, %arg1: i32) -> (i32, i32, i32) {
    %c0_i32 = arith.constant 0 : i32
    %c0_i32_0 = arith.constant 0 : i32
    %c0_i32_1 = arith.constant 0 : i32
    return %arg0, %c0_i32, %c0_i32_0 : i32, i32, i32
  }
  func.func @transform_1(%arg0: i32, %arg1: i32) -> (i32, i32) {
    %c0_i32 = arith.constant 0 : i32
    %c0_i32_0 = arith.constant 0 : i32
    %c0_i32_1 = arith.constant 0 : i32
    return %c0_i32, %c0_i32_0 : i32, i32
  }
  func.func @transform_2(%arg0: i32, %arg1: i32) -> (i32, i32) {
    %c0_i32 = arith.constant 0 : i32
    %c0_i32_0 = arith.constant 0 : i32
    %c0_i32_1 = arith.constant 0 : i32
    return %c0_i32, %c0_i32_0 : i32, i32
  }
  func.func @transform_3(%arg0: i32, %arg1: i32) -> (i32, i32) {
    %c0_i32 = arith.constant 0 : i32
    %c0_i32_0 = arith.constant 0 : i32
    %c0_i32_1 = arith.constant 0 : i32
    return %c0_i32, %c0_i32_0 : i32, i32
  }
  func.func @transform_4(%arg0: i32, %arg1: i32) -> (i32, i32) {
    %c0_i32 = arith.constant 0 : i32
    %c0_i32_0 = arith.constant 0 : i32
    %c0_i32_1 = arith.constant 0 : i32
    return %c0_i32, %c0_i32_0 : i32, i32
  }
  func.func @transform_5(%arg0: i32, %arg1: i32) -> (i32, i32, i32) {
    %c0_i32 = arith.constant 0 : i32
    %c0_i32_0 = arith.constant 0 : i32
    %c0_i32_1 = arith.constant 0 : i32
    return %arg0, %c0_i32, %c0_i32_0 : i32, i32, i32
  }
  func.func @transform_6(%arg0: i32, %arg1: i32) -> (i32, i32, i32) {
    %c0_i32 = arith.constant 0 : i32
    %c0_i32_0 = arith.constant 0 : i32
    %c0_i32_1 = arith.constant 0 : i32
    return %arg0, %c0_i32, %c0_i32_0 : i32, i32, i32
  }
}

</mosaic_0001>

<bundles_post_ra>
// kernel: tpu_custom_call.1
= control target key start
LH: loop header
LB: loop body
LE: loop exit
PB: predicated region body
PF: predicated region fallthrough
CT: control target
= control target key end

     0   :  { %12 = vsyncpa [#allocation5], 0  ;;  %s1214_s0 = inlined_call_operand.hbm [shape: f32[2,8,32], index: 0, kind: input, shape index: {}]   ;;  %s1215_s1 = inlined_call_operand.hbm [shape: f32[32,96], index: 1, kind: input, shape index: {}]   ;;  %s1216_s2 = inlined_call_operand.hbm [shape: f32[32,32], index: 2, kind: input, shape index: {}]   ;;  %s1217_s3 = inlined_call_operand.vmem [shape: f32[1,96], index: 3, kind: input, shape index: {}]   ;;  %s1218_s4 = inlined_call_operand.vmem [shape: f32[1,32], index: 4, kind: input, shape index: {}]   ;;  %s1219_s5 = inlined_call_operand.hbm [shape: f32[2,8,32], index: 5, kind: output, shape index: {0}]   ;;  %s1220_s6 = inlined_call_operand.hbm [shape: f32[2,8,8], index: 6, kind: output, shape index: {1}]  }
   0x1   :  { %13 = vsyncpa [#allocation8], 0 }
   0x2   :  { %14 = vsyncpa [#allocation6], 0 }
   0x3   :  { %15 = vsyncpa [#allocation12], 0  ;;  %s1081_s21 = smov 0   ;;  %s1083_s22 = smov 0  }
   0x4   :  { %s1085_s23 = smov 0  }
   0x5 LB: > { %s717_s24 = sadd.s32 4294967295, %s1031_s23   ;;  %p718_p0 = scmp.ge.s32.totalorder %s1031_s23, 1  ;;  %s1031_s23 = sphi %s1085_s23, %s21_s23   ;;  %s1027_s22 = sphi %s1083_s22, %s1226_s22   ;;  %s1023_s21 = sphi %s1081_s21, %s1225_s21  }
   0x6   : > { %p200_p1 = scmp.lt.s32.totalorder %s1031_s23, 3  ;;  %p1101_p2 = scmp.eq.s32.totalorder %s717_s24, 0 }
   0x7   : > { %s228_s28 = sshll.u32 %s1215_s1, 4  ;;  %s1033_s30 = smov [#allocation7]   ;;  %s229_s28 = int_to_ptr.hbm [resolvable:$true] %s228_s28 }
   0x8   : > { %p1108_p3 = pnand %p718_p0, %p200_p1  ;;  %s230_s7 = sshll.u32 %s1033_s30, 4  ;;  %s231_s7 = int_to_ptr.vmem [resolvable:$true] %s230_s7 }
   0x9   : > { %s30_s9 = sadd.s32 1, %s1027_s22  ;;  %s1034_s10 = smov 128  }
   0xa   : > { %p775_p4 = pneg %p1108_p3  ;;  %p31_p6 = scmp.ge.s32.totalorder %s30_s9, 2 }
   0xb   : > { %s1035_s11 = smov 8   ;;  %s214_s14 = sshll.u32 %s1214_s0, 4  ;;  %s215_s14 = int_to_ptr.hbm [resolvable:$true] %s214_s14 }
   0xc   : > { %p1116_p5 = pnand %p1101_p2, %p775_p4  ;;  %s1228_s9 = smov (%p31_p6, %s30_s9), 0 }
   0xd   : > { %s1036_s15 = smov [#allocation4]   ;;  %s242_s19 = sshll.u32 %s1216_s2, 4  ;;  %s243_s19 = int_to_ptr.hbm [resolvable:$true] %s242_s19 }
   0xe   : > { %781 = dma.hbm_to_vmem [thread:$0]  (!%p1116_p5), %s229_s28, 512, %s231_s7, [#allocation8], %s1034_s10, %s1034_s10, %s1035_s11  }
   0xf   : > { %s216_s16 = sshll.u32 %s1036_s15, 4  ;;  %s1037_s20 = smov [#allocation9]   ;;  %s217_s16 = int_to_ptr.vmem [resolvable:$true] %s216_s16 }
  0x10   : > { %778 = dma.hbm_to_vmem [thread:$0]  (!%p1116_p5), %s215_s14, 256, %s217_s16, [#allocation5], %s1034_s10, %s1034_s10, %s1035_s11  }
  0x11   : > { %s244_s26 = sshll.u32 %s1037_s20, 4  ;;  %266 = sbr.rel (%p1108_p3) target bundleno = 1234 (0x4d2), region = 40  ;;  %s245_s26 = int_to_ptr.vmem [resolvable:$true] %s244_s26 }
  0x12   : > { %784 = dma.hbm_to_vmem [thread:$0]  (!%p1116_p5), %s243_s19, 512, %s245_s26, [#allocation8], %s1034_s10, %s1034_s10, %s1035_s11  }
  0x16   : > { %1006 = dma.done.wait (%p1101_p2), [#allocation5], 256  }
  0x17   : > { %1008 = vsyncadd (%p1101_p2), [#allocation5], 4294967040 }
  0x18   : > { %1010 = dma.done.wait (%p1101_p2), [#allocation8], 1024  }
  0x19   : > { %1012 = vsyncadd (%p1101_p2), [#allocation8], 4294966272  ;;  %p726_p7 = scmp.ne.s32.totalorder %s1023_s21, 0 }
  0x1a   : > { %s1038_s28 = smov (!%p726_p7), 80  }
  0x1b   : > { %303 = sbr.rel (%p726_p7) target bundleno = 292 (0x124), region = 56 }
  0x20   : > { %v309_v0 = vld [vmem:[#allocation7 + $0x18] sm:$0xff]  ;;  %v308_v1 = vld [vmem:[#allocation7 + $0x10] sm:$0xff]  ;;  %v307_v2 = vld [vmem:[#allocation7 + $0x8] sm:$0xff]  ;;  %vm314_vm0 = vcmask 261120   ;;  %vm344_vm1 = vcmask 392192  }
  0x21   : > { %333 = vmatpush.msra.mxu0 %v309_v0  ;;  %747 = vmatpush.msra.mxu1 %v309_v0  ;;  %v306_v3 = vld [vmem:[#allocation7] sm:$0xff]  ;;  %v304_v4 = vld [vmem:[#allocation4] sm:$0xff]  ;;  %v305_v5 = vld [vmem:[#allocation4 + $0x8] sm:$0xff] }
  0x22   : > { %v832_v6 = vld [vmem:[%s1217_s3] ss:$0 sm:$0xff] }
  0x23   : > { %334 = vmatpush.msra.mxu0 %v308_v1  ;;  %748 = vmatpush.msra.mxu1 %v308_v1 }
  0x25   : > { %335 = vmatpush.msra.mxu0 %v307_v2  ;;  %749 = vmatpush.msra.mxu1 %v307_v2 }
  0x27   : > { %336 = vmatpush.msra.mxu0 %v306_v3  ;;  %750 = vmatpush.msra.mxu1 %v306_v3 }
  0x28   : > { %727 = vmatmul.msk.f32.vlgmr.msra.gmra.mxu0 %vm314_vm0, %v304_v4  ;;  %728 = vmatmul.msk.f32.vlgmr.msra.gmra.mxu1 %vm314_vm0, %v305_v5 }
  0xa5   : > { %v338_v7 = vpop.f32.mrf.mxu0  ;;  %v341_v8 = vpop.f32.mrf.mxu1 }
  0xa6   : > { %v339_v9 = vadd.f32 %v832_v6, %v338_v7  ;;  %v342_v10 = vadd.f32 %v832_v6, %v341_v8 }
  0xa8   : > { %345 = vst.msk [vmem:[#allocation2] sm:$0xff] %vm344_vm1, %v339_v9  ;;  %349 = vrot.lane.b32.xlu0 %v339_v9, %s1038_s28 }
  0xa9   : > { %346 = vst.msk [vmem:[#allocation2 + $0x8] sm:$0xff] %vm344_vm1, %v342_v10 }
  0xb0   : > { %351 = vrot.lane.b32.xlu0 %v342_v10, %s1038_s28 }
 0x11a   : > { %v350_v11 = vpop.permute.xlu0 %349 }
 0x11b   : > { %356 = vst.msk [vmem:[#allocation2 + $0x10] sm:$0xff] %vm344_vm1, %v350_v11 }
 0x122   : > { %v352_v12 = vpop.permute.xlu0 %351 }
 0x123   : > { %357 = vst.msk [vmem:[#allocation2 + $0x18] sm:$0xff] %vm344_vm1, %v352_v12 }
 0x124 PF: > { %s729_s29 = sshll.u32 %s1023_s21, 4  ;;  %s1039_s7 = smov 112   ;;  %vm365_vm2 = vcmask 130048   ;;  %vm417_vm3 = vcmask 64512  }
 0x125   : > { %s359_s30 = scalar_lea.vmem [#allocation2], %s729_s29  ;;  %s1040_s8 = smov 96  }
 0x126   : > { %s518_s10 = scalar_lea.vmem [#allocation3], %s729_s29 }
 0x12a   : > { %v360_v13 = vld [vmem:[%s359_s30] sm:$0xff]  ;;  %v361_v14 = vld [vmem:[%s359_s30 + $0x8] sm:$0xff] }
 0x12b   : > { %363 = vrot.lane.b32.xlu0 %v360_v13, %s1039_s7  ;;  %v833_v21 = vpack.i.bf16 %v361_v14, %v360_v13 }
 0x133   : > { %391 = vrot.lane.b32.xlu0 %v361_v14, %s1039_s7 }
 0x13b   : > { %834 = vrot.lane.b32.xlu0 %v833_v21, %s1040_s8 }
 0x19d   : > { %v364_v15 = vpop.permute.xlu0 %363 }
 0x19e   : > { %730 = vmatpush.xpose.msk.msra.mxu0 %vm365_vm2, %v364_v15 }
 0x1a1   : > { %731 = vmatmul.msk.f32.vlgmr.msra.gmra.mxu0 %vm365_vm2, %v360_v13 }
 0x1a5   : > { %v392_v16 = vpop.permute.xlu0 %391 }
 0x1a6   : > { %732 = vmatpush.xpose.msk.msra.mxu1 %vm365_vm2, %v392_v16 }
 0x1a9   : > { %733 = vmatmul.msk.f32.vlgmr.msra.gmra.mxu1 %vm365_vm2, %v361_v14 }
 0x1ad   : > { %v835_v32 = vpop.permute.xlu0 %834 }
 0x1ae   : > { %v836_v33 = vunpack.i.l.bf16 %v835_v32  ;;  %v837_v34 = vunpack.i.h.bf16 %v835_v32 }
 0x1b0   : > { %487 = vmatpush.msra.mxu2 %v836_v33  ;;  %513 = vmatpush.msra.mxu3 %v837_v34 }
 0x21e   : > { %v387_v17 = vpop.f32.mrf.mxu0 }
 0x21f   : > { %v418_v18 = vsel %vm417_vm3, %v387_v17, -inf }
 0x220   : > { %419 = vmax.xlane.f32.xlu1 %v418_v18 }
 0x226   : > { %v414_v19 = vpop.f32.mrf.mxu1 }
 0x227   : > { %v421_v20 = vsel %vm417_vm3, %v414_v19, -inf }
 0x228   : > { %422 = vmax.xlane.f32.xlu1 %v421_v20 }
 0x293   : > { %v420_v22 = vpop.xlane.xlu1 %419 }
 0x294   : > { %v424_v23 = vsub.f32 %v387_v17, %v420_v22 }
 0x296   : > { %v426_v24 = vmul.f32 1.442695, %v424_v23 }
 0x298   : > { %838 = vpow2.f32 %v426_v24 }
 0x29b   : > { %v423_v25 = vpop.xlane.xlu1 %422 }
 0x29c   : > { %v425_v26 = vsub.f32 %v414_v19, %v423_v25 }
 0x29e   : > { %v839_v27 = vpop.eup %838  ;;  %v428_v28 = vmul.f32 1.442695, %v425_v26 }
 0x29f   : > { %v430_v29 = vsel %vm417_vm3, %v839_v27, 0.0 }
 0x2a0   : > { %840 = vpow2.f32 %v428_v28  ;;  %431 = vadd.xlane.f32.xlu2 %v430_v29 }
 0x2a6   : > { %v841_v30 = vpop.eup %840 }
 0x2a7   : > { %v433_v31 = vsel %vm417_vm3, %v841_v30, 0.0 }
 0x2a8   : > { %434 = vadd.xlane.f32.xlu2 %v433_v31 }
 0x313   : > { %v432_v35 = vpop.xlane.xlu2 %431 }
 0x314   : > { %842 = vrcp.f32 %v432_v35  ;;  %v447_v40 = vand.u32 2147483648, %v432_v35  ;;  %v445_v42 = vand.u32 2147483647, %v432_v35  ;;  %vm441_vm5 = vweird.f32 %v432_v35 }
 0x316   : > { %v448_v45 = vor.u32 1.1754944e-38, %v447_v40  ;;  %vm446_vm7 = vcmp.eq.f32.partialorder %v445_v42, 8.507059e+37 }
 0x31a   : > { %v843_v36 = vpop.eup %842 }
 0x31b   : > { %v437_v37 = vmul.f32 %v843_v36, %v432_v35  ;;  %v435_v38 = vpop.xlane.xlu2 %434  ;;  %vm442_vm4 = vweird.f32 %v843_v36 }
 0x31c   : > { %844 = vrcp.f32 %v435_v38  ;;  %vm443_vm6 = vmor %vm441_vm5, %vm442_vm4  ;;  %v461_v51 = vand.u32 2147483648, %v435_v38  ;;  %v459_v53 = vand.u32 2147483647, %v435_v38  ;;  %vm455_vm9 = vweird.f32 %v435_v38 }
 0x31d   : > { %v438_v39 = vsub.f32 1.0, %v437_v37 }
 0x31e   : > { %v462_v56 = vor.u32 1.1754944e-38, %v461_v51  ;;  %vm460_vm11 = vcmp.eq.f32.partialorder %v459_v53, 8.507059e+37 }
 0x31f   : > { %v439_v41 = vmul.f32 %v843_v36, %v438_v39 }
 0x321   : > { %v440_v43 = vadd.f32 %v843_v36, %v439_v41 }
 0x322   : > { %v845_v44 = vpop.eup %844 }
 0x323   : > { %v451_v46 = vmul.f32 %v845_v44, %v435_v38  ;;  %v444_v47 = vsel %vm443_vm6, %v843_v36, %v440_v43  ;;  %vm456_vm8 = vweird.f32 %v845_v44 }
 0x324   : > { %v449_v48 = vsel %vm446_vm7, %v448_v45, %v444_v47  ;;  %vm457_vm10 = vmor %vm455_vm9, %vm456_vm8 }
 0x325   : > { %v452_v49 = vsub.f32 1.0, %v451_v46  ;;  %v464_v50 = vmul.f32 %v839_v27, %v449_v48 }
 0x327   : > { %v453_v52 = vmul.f32 %v845_v44, %v452_v49  ;;  %734 = vmatmul.msk.f32.vlgmr.msra.gmra.mxu2 %vm417_vm3, %v464_v50  ;;  %v521_v54 = vmul.f32 0.5, %v464_v50 }
 0x329   : > { %v454_v55 = vadd.f32 %v845_v44, %v453_v52 }
 0x32b   : > { %v458_v57 = vsel %vm457_vm10, %v845_v44, %v454_v55 }
 0x32c   : > { %v463_v58 = vsel %vm460_vm11, %v462_v56, %v458_v57 }
 0x32d   : > { %v465_v59 = vmul.f32 %v841_v30, %v463_v58 }
 0x32f   : > { %735 = vmatmul.msk.f32.vlgmr.msra.gmra.mxu3 %vm417_vm3, %v465_v59  ;;  %v522_v60 = vmul.f32 0.5, %v465_v59 }
 0x3aa   : > { %v489_v61 = vpop.f32.mrf.mxu2 }
 0x3ab   : > { %519 = vst.msk [vmem:[%s518_s10] sm:$0xff] %vm365_vm2, %v489_v61 }
 0x3af   : > { %525 = sbr.rel (%p726_p7) target bundleno = 950 (0x3b6), region = 60 }
 0x3b2   : > { %v515_v62 = vpop.f32.mrf.mxu3 }
 0x3b3   : > { %520 = vst.msk [vmem:[%s518_s10 + $0x8] sm:$0xff] %vm365_vm2, %v515_v62 }
 0x3b4   : > { %526 = vst.msk [vmem:[#allocation11] sm:$0xff] %vm417_vm3, %v521_v54 }
 0x3b5   : > { %527 = vst.msk [vmem:[#allocation11 + $0x8] sm:$0xff] %vm417_vm3, %v522_v60 }
 0x3b6 PF: > { %p737_p8 = scmp.le.s32.totalorder %s1023_s21, 0 }
 0x3b8   : > { %531 = sbr.rel (%p737_p8) target bundleno = 962 (0x3c2), region = 64 }
 0x3bd   : > { %v532_v63 = vld [vmem:[#allocation11] sm:$0xff]  ;;  %v533_v0 = vld [vmem:[#allocation11 + $0x8] sm:$0xff] }
 0x3be   : > { %v534_v1 = vadd.f32 %v532_v63, %v521_v54  ;;  %v535_v2 = vadd.f32 %v533_v0, %v522_v60 }
 0x3c0   : > { %536 = vst.msk [vmem:[#allocation11] sm:$0xff] %vm417_vm3, %v534_v1 }
 0x3c1   : > { %537 = vst.msk [vmem:[#allocation11 + $0x8] sm:$0xff] %vm417_vm3, %v535_v2 }
 0x3c2 PF: > { %p738_p9 = scmp.ne.s32.totalorder %s1023_s21, 1 }
 0x3c3   : > { %s1041_s11 = smov (!%p738_p9), 16  }
 0x3c4   : > { %541 = sbr.rel (%p738_p9) target bundleno = 1223 (0x4c7), region = 68 }
 0x3c9   : > { %v545_v3 = vld [vmem:[#allocation3 + $0x10] sm:$0xff]  ;;  %v560_v4 = vld [vmem:[#allocation9 + $0x18] sm:$0xff]  ;;  %v559_v5 = vld [vmem:[#allocation9 + $0x10] sm:$0xff]  ;;  %vm565_vm12 = vcmask 261120  }
 0x3ca   : > { %549 = vrot.lane.b32.xlu0 %v545_v3, %s1041_s11  ;;  %584 = vmatpush.msra.mxu0 %v560_v4  ;;  %v558_v6 = vld [vmem:[#allocation9 + $0x8] sm:$0xff]  ;;  %v557_v8 = vld [vmem:[#allocation9] sm:$0xff]  ;;  %v542_v9 = vld [vmem:[#allocation3] sm:$0xff] }
 0x3cb   : > { %751 = vmatpush.msra.mxu1 %v560_v4  ;;  %v546_v7 = vld [vmem:[#allocation3 + $0x18] sm:$0xff]  ;;  %v543_v12 = vld [vmem:[#allocation3 + $0x8] sm:$0xff]  ;;  %v846_v15 = vld [vmem:[%s1218_s4] ss:$0 sm:$0xff] }
 0x3cc   : > { %585 = vmatpush.msra.mxu0 %v559_v5 }
 0x3cd   : > { %752 = vmatpush.msra.mxu1 %v559_v5 }
 0x3ce   : > { %586 = vmatpush.msra.mxu0 %v558_v6 }
 0x3cf   : > { %753 = vmatpush.msra.mxu1 %v558_v6 }
 0x3d0   : > { %587 = vmatpush.msra.mxu0 %v557_v8 }
 0x3d1   : > { %754 = vmatpush.msra.mxu1 %v557_v8 }
 0x3d2   : > { %551 = vrot.lane.b32.xlu0 %v546_v7, %s1041_s11 }
 0x43c   : > { %v550_v10 = vpop.permute.xlu0 %549 }
 0x43d   : > { %v555_v11 = vsel %vm365_vm2, %v542_v9, %v550_v10 }
 0x43e   : > { %739 = vmatmul.msk.f32.vlgmr.msra.gmra.mxu0 %vm565_vm12, %v555_v11 }
 0x444   : > { %v552_v13 = vpop.permute.xlu0 %551 }
 0x445   : > { %v556_v14 = vsel %vm365_vm2, %v543_v12, %v552_v13 }
 0x446   : > { %740 = vmatmul.msk.f32.vlgmr.msra.gmra.mxu1 %vm565_vm12, %v556_v14 }
 0x4bb   : > { %v589_v16 = vpop.f32.mrf.mxu0 }
 0x4bc   : > { %v590_v17 = vadd.f32 %v846_v15, %v589_v16 }
 0x4be   : > { %595 = vst.msk [vmem:[#allocation10] sm:$0xff] %vm565_vm12, %v590_v17 }
 0x4c3   : > { %v592_v18 = vpop.f32.mrf.mxu1 }
 0x4c4   : > { %v593_v19 = vadd.f32 %v846_v15, %v592_v18 }
 0x4c6   : > { %596 = vst.msk [vmem:[#allocation10 + $0x8] sm:$0xff] %vm565_vm12, %v593_v19 }
 0x4c7 PF: > { %p1183_p10 = scmp.eq.s32.totalorder %s717_s24, 1  ;;  %s607_s16 = sshll.u32 %s1219_s5, 4  ;;  %s608_s16 = int_to_ptr.hbm [resolvable:$true] %s607_s16 }
 0x4c8   : > { %s1042_s17 = smov [#allocation10]   ;;  %s1043_s19 = smov 128  }
 0x4c9   : > { %s605_s18 = sshll.u32 %s1042_s17, 4  ;;  %s1044_s20 = smov 8   ;;  %s606_s18 = int_to_ptr.vmem [resolvable:$true] %s605_s18 }
 0x4ca   : > { %768 = dma.vmem_to_hbm [thread:$0]  (%p1183_p10), %s606_s18, 256, %s608_s16, [#allocation6], %s1043_s19, %s1043_s19, %s1044_s20  }
 0x4cb   : > { %s1045_s26 = smov [#allocation11]   ;;  %s624_s28 = sshll.u32 %s1220_s6, 4  ;;  %s625_s28 = int_to_ptr.hbm [resolvable:$true] %s624_s28 }
 0x4cc   : > { %s622_s24 = sshll.u32 %s1045_s26, 4  ;;  %s623_s24 = int_to_ptr.vmem [resolvable:$true] %s622_s24 }
 0x4cd   : > { %770 = dma.vmem_to_hbm [thread:$0]  (%p1183_p10), %s623_s24, 256, %s625_s28, [#allocation12], %s1043_s19, %s1043_s19, %s1044_s20  }
 0x4ce   : > { %1014 = dma.done.wait (%p1183_p10), [#allocation6], 256  }
 0x4cf   : > { %1016 = vsyncadd (%p1183_p10), [#allocation6], 4294967040 }
 0x4d0   : > { %1018 = dma.done.wait (%p1183_p10), [#allocation12], 256  }
 0x4d1   : > { %1020 = vsyncadd (%p1183_p10), [#allocation12], 4294967040 }
 0x4d2 PF: > { %s21_s23 = sadd.s32 1, %s1031_s23   ;;  %s1225_s21 = smov %s1027_s22 }
 0x4d3   : > { %p18_p11 = scmp.ge.s32.totalorder %s21_s23, 4   ;;  %s1226_s22 = smov %s1228_s9 }
 0x4d5   :  { %20 = sbr.rel (!%p18_p11) target bundleno = 5 (0x5), region = 108 }
 0x4da   :  { %646 = vsyncpa [#allocation5], 1 }
 0x4db   :  { %648 = vsyncpa [#allocation5 + $0x1], 1 }
 0x4dc   :  { %649 = vsyncpa [#allocation8], 1 }
 0x4dd   :  { %650 = vsyncpa [#allocation6], 1 }
 0x4de   :  { %652 = vsyncpa [#allocation6 + $0x1], 1 }
 0x4df   :  { %653 = vsyncpa [#allocation12], 1 }

// kernel: tpu_custom_call.1
= control target key start
LH: loop header
LB: loop body
LE: loop exit
PB: predicated region body
PF: predicated region fallthrough
CT: control target
= control target key end

     0   :  { %12 = vsyncpa [#allocation5], 0  ;;  %s1214_s0 = inlined_call_operand.hbm [shape: f32[2,8,32], index: 0, kind: input, shape index: {}]   ;;  %s1215_s1 = inlined_call_operand.hbm [shape: f32[32,96], index: 1, kind: input, shape index: {}]   ;;  %s1216_s2 = inlined_call_operand.hbm [shape: f32[32,32], index: 2, kind: input, shape index: {}]   ;;  %s1217_s3 = inlined_call_operand.vmem [shape: f32[1,96], index: 3, kind: input, shape index: {}]   ;;  %s1218_s4 = inlined_call_operand.vmem [shape: f32[1,32], index: 4, kind: input, shape index: {}]   ;;  %s1219_s5 = inlined_call_operand.hbm [shape: f32[2,8,32], index: 5, kind: output, shape index: {0}]   ;;  %s1220_s6 = inlined_call_operand.hbm [shape: f32[2,8,8], index: 6, kind: output, shape index: {1}]  }
   0x1   :  { %13 = vsyncpa [#allocation8], 0 }
   0x2   :  { %14 = vsyncpa [#allocation6], 0 }
   0x3   :  { %15 = vsyncpa [#allocation12], 0  ;;  %s1081_s21 = smov 0   ;;  %s1083_s22 = smov 0  }
   0x4   :  { %s1085_s23 = smov 0  }
   0x5 LB: > { %s717_s24 = sadd.s32 4294967295, %s1031_s23   ;;  %p718_p0 = scmp.ge.s32.totalorder %s1031_s23, 1  ;;  %s1031_s23 = sphi %s1085_s23, %s21_s23   ;;  %s1027_s22 = sphi %s1083_s22, %s1226_s22   ;;  %s1023_s21 = sphi %s1081_s21, %s1225_s21  }
   0x6   : > { %p200_p1 = scmp.lt.s32.totalorder %s1031_s23, 3  ;;  %p1101_p2 = scmp.eq.s32.totalorder %s717_s24, 0 }
   0x7   : > { %s228_s28 = sshll.u32 %s1215_s1, 4  ;;  %s1033_s30 = smov [#allocation7]   ;;  %s229_s28 = int_to_ptr.hbm [resolvable:$true] %s228_s28 }
   0x8   : > { %p1108_p3 = pnand %p718_p0, %p200_p1  ;;  %s230_s7 = sshll.u32 %s1033_s30, 4  ;;  %s231_s7 = int_to_ptr.vmem [resolvable:$true] %s230_s7 }
   0x9   : > { %s30_s9 = sadd.s32 1, %s1027_s22  ;;  %s1034_s10 = smov 128  }
   0xa   : > { %p775_p4 = pneg %p1108_p3  ;;  %p31_p6 = scmp.ge.s32.totalorder %s30_s9, 2 }
   0xb   : > { %s1035_s11 = smov 8   ;;  %s214_s14 = sshll.u32 %s1214_s0, 4  ;;  %s215_s14 = int_to_ptr.hbm [resolvable:$true] %s214_s14 }
   0xc   : > { %p1116_p5 = pnand %p1101_p2, %p775_p4  ;;  %s1228_s9 = smov (%p31_p6, %s30_s9), 0 }
   0xd   : > { %s1036_s15 = smov [#allocation4]   ;;  %s242_s19 = sshll.u32 %s1216_s2, 4  ;;  %s243_s19 = int_to_ptr.hbm [resolvable:$true] %s242_s19 }
   0xe   : > { %781 = dma.hbm_to_vmem [thread:$0]  (!%p1116_p5), %s229_s28, 512, %s231_s7, [#allocation8], %s1034_s10, %s1034_s10, %s1035_s11  }
   0xf   : > { %s216_s16 = sshll.u32 %s1036_s15, 4  ;;  %s1037_s20 = smov [#allocation9]   ;;  %s217_s16 = int_to_ptr.vmem [resolvable:$true] %s216_s16 }
  0x10   : > { %778 = dma.hbm_to_vmem [thread:$0]  (!%p1116_p5), %s215_s14, 256, %s217_s16, [#allocation5], %s1034_s10, %s1034_s10, %s1035_s11  }
  0x11   : > { %s244_s26 = sshll.u32 %s1037_s20, 4  ;;  %266 = sbr.rel (%p1108_p3) target bundleno = 1234 (0x4d2), region = 40  ;;  %s245_s26 = int_to_ptr.vmem [resolvable:$true] %s244_s26 }
  0x12   : > { %784 = dma.hbm_to_vmem [thread:$0]  (!%p1116_p5), %s243_s19, 512, %s245_s26, [#allocation8], %s1034_s10, %s1034_s10, %s1035_s11  }
  0x16   : > { %1006 = dma.done.wait (%p1101_p2), [#allocation5], 256  }
  0x17   : > { %1008 = vsyncadd (%p1101_p2), [#allocation5], 4294967040 }
  0x18   : > { %1010 = dma.done.wait (%p1101_p2), [#allocation8], 1024  }
  0x19   : > { %1012 = vsyncadd (%p1101_p2), [#allocation8], 4294966272  ;;  %p726_p7 = scmp.ne.s32.totalorder %s1023_s21, 0 }
  0x1a   : > { %s1038_s28 = smov (!%p726_p7), 80  }
  0x1b   : > { %303 = sbr.rel (%p726_p7) target bundleno = 292 (0x124), region = 56 }
  0x20   : > { %v309_v0 = vld [vmem:[#allocation7 + $0x18] sm:$0xff]  ;;  %v308_v1 = vld [vmem:[#allocation7 + $0x10] sm:$0xff]  ;;  %v307_v2 = vld [vmem:[#allocation7 + $0x8] sm:$0xff]  ;;  %vm314_vm0 = vcmask 261120   ;;  %vm344_vm1 = vcmask 392192  }
  0x21   : > { %333 = vmatpush.msra.mxu0 %v309_v0  ;;  %747 = vmatpush.msra.mxu1 %v309_v0  ;;  %v306_v3 = vld [vmem:[#allocation7] sm:$0xff]  ;;  %v304_v4 = vld [vmem:[#allocation4] sm:$0xff]  ;;  %v305_v5 = vld [vmem:[#allocation4 + $0x8] sm:$0xff] }
  0x22   : > { %v832_v6 = vld [vmem:[%s1217_s3] ss:$0 sm:$0xff] }
  0x23   : > { %334 = vmatpush.msra.mxu0 %v308_v1  ;;  %748 = vmatpush.msra.mxu1 %v308_v1 }
  0x25   : > { %335 = vmatpush.msra.mxu0 %v307_v2  ;;  %749 = vmatpush.msra.mxu1 %v307_v2 }
  0x27   : > { %336 = vmatpush.msra.mxu0 %v306_v3  ;;  %750 = vmatpush.msra.mxu1 %v306_v3 }
  0x28   : > { %727 = vmatmul.msk.f32.vlgmr.msra.gmra.mxu0 %vm314_vm0, %v304_v4  ;;  %728 = vmatmul.msk.f32.vlgmr.msra.gmra.mxu1 %vm314_vm0, %v305_v5 }
  0xa5   : > { %v338_v7 = vpop.f32.mrf.mxu0  ;;  %v341_v8 = vpop.f32.mrf.mxu1 }
  0xa6   : > { %v339_v9 = vadd.f32 %v832_v6, %v338_v7  ;;  %v342_v10 = vadd.f32 %v832_v6, %v341_v8 }
  0xa8   : > { %345 = vst.msk [vmem:[#allocation2] sm:$0xff] %vm344_vm1, %v339_v9  ;;  %349 = vrot.lane.b32.xlu0 %v339_v9, %s1038_s28 }
  0xa9   : > { %346 = vst.msk [vmem:[#allocation2 + $0x8] sm:$0xff] %vm344_vm1, %v342_v10 }
  0xb0   : > { %351 = vrot.lane.b32.xlu0 %v342_v10, %s1038_s28 }
 0x11a   : > { %v350_v11 = vpop.permute.xlu0 %349 }
 0x11b   : > { %356 = vst.msk [vmem:[#allocation2 + $0x10] sm:$0xff] %vm344_vm1, %v350_v11 }
 0x122   : > { %v352_v12 = vpop.permute.xlu0 %351 }
 0x123   : > { %357 = vst.msk [vmem:[#allocation2 + $0x18] sm:$0xff] %vm344_vm1, %v352_v12 }
 0x124 PF: > { %s729_s29 = sshll.u32 %s1023_s21, 4  ;;  %s1039_s7 = smov 112   ;;  %vm365_vm2 = vcmask 130048   ;;  %vm417_vm3 = vcmask 64512  }
 0x125   : > { %s359_s30 = scalar_lea.vmem [#allocation2], %s729_s29  ;;  %s1040_s8 = smov 96  }
 0x126   : > { %s518_s10 = scalar_lea.vmem [#allocation3], %s729_s29 }
 0x12a   : > { %v360_v13 = vld [vmem:[%s359_s30] sm:$0xff]  ;;  %v361_v14 = vld [vmem:[%s359_s30 + $0x8] sm:$0xff] }
 0x12b   : > { %363 = vrot.lane.b32.xlu0 %v360_v13, %s1039_s7  ;;  %v833_v21 = vpack.i.bf16 %v361_v14, %v360_v13 }
 0x133   : > { %391 = vrot.lane.b32.xlu0 %v361_v14, %s1039_s7 }
 0x13b   : > { %834 = vrot.lane.b32.xlu0 %v833_v21, %s1040_s8 }
 0x19d   : > { %v364_v15 = vpop.permute.xlu0 %363 }
 0x19e   : > { %730 = vmatpush.xpose.msk.msra.mxu0 %vm365_vm2, %v364_v15 }
 0x1a1   : > { %731 = vmatmul.msk.f32.vlgmr.msra.gmra.mxu0 %vm365_vm2, %v360_v13 }
 0x1a5   : > { %v392_v16 = vpop.permute.xlu0 %391 }
 0x1a6   : > { %732 = vmatpush.xpose.msk.msra.mxu1 %vm365_vm2, %v392_v16 }
 0x1a9   : > { %733 = vmatmul.msk.f32.vlgmr.msra.gmra.mxu1 %vm365_vm2, %v361_v14 }
 0x1ad   : > { %v835_v32 = vpop.permute.xlu0 %834 }
 0x1ae   : > { %v836_v33 = vunpack.i.l.bf16 %v835_v32  ;;  %v837_v34 = vunpack.i.h.bf16 %v835_v32 }
 0x1b0   : > { %487 = vmatpush.msra.mxu2 %v836_v33  ;;  %513 = vmatpush.msra.mxu3 %v837_v34 }
 0x21e   : > { %v387_v17 = vpop.f32.mrf.mxu0 }
 0x21f   : > { %v418_v18 = vsel %vm417_vm3, %v387_v17, -inf }
 0x220   : > { %419 = vmax.xlane.f32.xlu1 %v418_v18 }
 0x226   : > { %v414_v19 = vpop.f32.mrf.mxu1 }
 0x227   : > { %v421_v20 = vsel %vm417_vm3, %v414_v19, -inf }
 0x228   : > { %422 = vmax.xlane.f32.xlu1 %v421_v20 }
 0x293   : > { %v420_v22 = vpop.xlane.xlu1 %419 }
 0x294   : > { %v424_v23 = vsub.f32 %v387_v17, %v420_v22 }
 0x296   : > { %v426_v24 = vmul.f32 1.442695, %v424_v23 }
 0x298   : > { %838 = vpow2.f32 %v426_v24 }
 0x29b   : > { %v423_v25 = vpop.xlane.xlu1 %422 }
 0x29c   : > { %v425_v26 = vsub.f32 %v414_v19, %v423_v25 }
 0x29e   : > { %v839_v27 = vpop.eup %838  ;;  %v428_v28 = vmul.f32 1.442695, %v425_v26 }
 0x29f   : > { %v430_v29 = vsel %vm417_vm3, %v839_v27, 0.0 }
 0x2a0   : > { %840 = vpow2.f32 %v428_v28  ;;  %431 = vadd.xlane.f32.xlu2 %v430_v29 }
 0x2a6   : > { %v841_v30 = vpop.eup %840 }
 0x2a7   : > { %v433_v31 = vsel %vm417_vm3, %v841_v30, 0.0 }
 0x2a8   : > { %434 = vadd.xlane.f32.xlu2 %v433_v31 }
 0x313   : > { %v432_v35 = vpop.xlane.xlu2 %431 }
 0x314   : > { %842 = vrcp.f32 %v432_v35  ;;  %v447_v40 = vand.u32 2147483648, %v432_v35  ;;  %v445_v42 = vand.u32 2147483647, %v432_v35  ;;  %vm441_vm5 = vweird.f32 %v432_v35 }
 0x316   : > { %v448_v45 = vor.u32 1.1754944e-38, %v447_v40  ;;  %vm446_vm7 = vcmp.eq.f32.partialorder %v445_v42, 8.507059e+37 }
 0x31a   : > { %v843_v36 = vpop.eup %842 }
 0x31b   : > { %v437_v37 = vmul.f32 %v843_v36, %v432_v35  ;;  %v435_v38 = vpop.xlane.xlu2 %434  ;;  %vm442_vm4 = vweird.f32 %v843_v36 }
 0x31c   : > { %844 = vrcp.f32 %v435_v38  ;;  %vm443_vm6 = vmor %vm441_vm5, %vm442_vm4  ;;  %v461_v51 = vand.u32 2147483648, %v435_v38  ;;  %v459_v53 = vand.u32 2147483647, %v435_v38  ;;  %vm455_vm9 = vweird.f32 %v435_v38 }
 0x31d   : > { %v438_v39 = vsub.f32 1.0, %v437_v37 }
 0x31e   : > { %v462_v56 = vor.u32 1.1754944e-38, %v461_v51  ;;  %vm460_vm11 = vcmp.eq.f32.partialorder %v459_v53, 8.507059e+37 }
 0x31f   : > { %v439_v41 = vmul.f32 %v843_v36, %v438_v39 }
 0x321   : > { %v440_v43 = vadd.f32 %v843_v36, %v439_v41 }
 0x322   : > { %v845_v44 = vpop.eup %844 }
 0x323   : > { %v451_v46 = vmul.f32 %v845_v44, %v435_v38  ;;  %v444_v47 = vsel %vm443_vm6, %v843_v36, %v440_v43  ;;  %vm456_vm8 = vweird.f32 %v845_v44 }
 0x324   : > { %v449_v48 = vsel %vm446_vm7, %v448_v45, %v444_v47  ;;  %vm457_vm10 = vmor %vm455_vm9, %vm456_vm8 }
 0x325   : > { %v452_v49 = vsub.f32 1.0, %v451_v46  ;;  %v464_v50 = vmul.f32 %v839_v27, %v449_v48 }
 0x327   : > { %v453_v52 = vmul.f32 %v845_v44, %v452_v49  ;;  %734 = vmatmul.msk.f32.vlgmr.msra.gmra.mxu2 %vm417_vm3, %v464_v50  ;;  %v521_v54 = vmul.f32 0.5, %v464_v50 }
 0x329   : > { %v454_v55 = vadd.f32 %v845_v44, %v453_v52 }
 0x32b   : > { %v458_v57 = vsel %vm457_vm10, %v845_v44, %v454_v55 }
 0x32c   : > { %v463_v58 = vsel %vm460_vm11, %v462_v56, %v458_v57 }
 0x32d   : > { %v465_v59 = vmul.f32 %v841_v30, %v463_v58 }
 0x32f   : > { %735 = vmatmul.msk.f32.vlgmr.msra.gmra.mxu3 %vm417_vm3, %v465_v59  ;;  %v522_v60 = vmul.f32 0.5, %v465_v59 }
 0x3aa   : > { %v489_v61 = vpop.f32.mrf.mxu2 }
 0x3ab   : > { %519 = vst.msk [vmem:[%s518_s10] sm:$0xff] %vm365_vm2, %v489_v61 }
 0x3af   : > { %525 = sbr.rel (%p726_p7) target bundleno = 950 (0x3b6), region = 60 }
 0x3b2   : > { %v515_v62 = vpop.f32.mrf.mxu3 }
 0x3b3   : > { %520 = vst.msk [vmem:[%s518_s10 + $0x8] sm:$0xff] %vm365_vm2, %v515_v62 }
 0x3b4   : > { %526 = vst.msk [vmem:[#allocation11] sm:$0xff] %vm417_vm3, %v521_v54 }
 0x3b5   : > { %527 = vst.msk [vmem:[#allocation11 + $0x8] sm:$0xff] %vm417_vm3, %v522_v60 }
 0x3b6 PF: > { %p737_p8 = scmp.le.s32.totalorder %s1023_s21, 0 }
 0x3b8   : > { %531 = sbr.rel (%p737_p8) target bundleno = 962 (0x3c2), region = 64 }
 0x3bd   : > { %v532_v63 = vld [vmem:[#allocation11] sm:$0xff]  ;;  %v533_v0 = vld [vmem:[#allocation11 + $0x8] sm:$0xff] }
 0x3be   : > { %v534_v1 = vadd.f32 %v532_v63, %v521_v54  ;;  %v535_v2 = vadd.f32 %v533_v0, %v522_v60 }
 0x3c0   : > { %536 = vst.msk [vmem:[#allocation11] sm:$0xff] %vm417_vm3, %v534_v1 }
 0x3c1   : > { %537 = vst.msk [vmem:[#allocation11 + $0x8] sm:$0xff] %vm417_vm3, %v535_v2 }
 0x3c2 PF: > { %p738_p9 = scmp.ne.s32.totalorder %s1023_s21, 1 }
 0x3c3   : > { %s1041_s11 = smov (!%p738_p9), 16  }
 0x3c4   : > { %541 = sbr.rel (%p738_p9) target bundleno = 1223 (0x4c7), region = 68 }
 0x3c9   : > { %v545_v3 = vld [vmem:[#allocation3 + $0x10] sm:$0xff]  ;;  %v560_v4 = vld [vmem:[#allocation9 + $0x18] sm:$0xff]  ;;  %v559_v5 = vld [vmem:[#allocation9 + $0x10] sm:$0xff]  ;;  %vm565_vm12 = vcmask 261120  }
 0x3ca   : > { %549 = vrot.lane.b32.xlu0 %v545_v3, %s1041_s11  ;;  %584 = vmatpush.msra.mxu0 %v560_v4  ;;  %v558_v6 = vld [vmem:[#allocation9 + $0x8] sm:$0xff]  ;;  %v557_v8 = vld [vmem:[#allocation9] sm:$0xff]  ;;  %v542_v9 = vld [vmem:[#allocation3] sm:$0xff] }
 0x3cb   : > { %751 = vmatpush.msra.mxu1 %v560_v4  ;;  %v546_v7 = vld [vmem:[#allocation3 + $0x18] sm:$0xff]  ;;  %v543_v12 = vld [vmem:[#allocation3 + $0x8] sm:$0xff]  ;;  %v846_v15 = vld [vmem:[%s1218_s4] ss:$0 sm:$0xff] }
 0x3cc   : > { %585 = vmatpush.msra.mxu0 %v559_v5 }
 0x3cd   : > { %752 = vmatpush.msra.mxu1 %v559_v5 }
 0x3ce   : > { %586 = vmatpush.msra.mxu0 %v558_v6 }
 0x3cf   : > { %753 = vmatpush.msra.mxu1 %v558_v6 }
 0x3d0   : > { %587 = vmatpush.msra.mxu0 %v557_v8 }
 0x3d1   : > { %754 = vmatpush.msra.mxu1 %v557_v8 }
 0x3d2   : > { %551 = vrot.lane.b32.xlu0 %v546_v7, %s1041_s11 }
 0x43c   : > { %v550_v10 = vpop.permute.xlu0 %549 }
 0x43d   : > { %v555_v11 = vsel %vm365_vm2, %v542_v9, %v550_v10 }
 0x43e   : > { %739 = vmatmul.msk.f32.vlgmr.msra.gmra.mxu0 %vm565_vm12, %v555_v11 }
 0x444   : > { %v552_v13 = vpop.permute.xlu0 %551 }
 0x445   : > { %v556_v14 = vsel %vm365_vm2, %v543_v12, %v552_v13 }
 0x446   : > { %740 = vmatmul.msk.f32.vlgmr.msra.gmra.mxu1 %vm565_vm12, %v556_v14 }
 0x4bb   : > { %v589_v16 = vpop.f32.mrf.mxu0 }
 0x4bc   : > { %v590_v17 = vadd.f32 %v846_v15, %v589_v16 }
 0x4be   : > { %595 = vst.msk [vmem:[#allocation10] sm:$0xff] %vm565_vm12, %v590_v17 }
 0x4c3   : > { %v592_v18 = vpop.f32.mrf.mxu1 }
 0x4c4   : > { %v593_v19 = vadd.f32 %v846_v15, %v592_v18 }
 0x4c6   : > { %596 = vst.msk [vmem:[#allocation10 + $0x8] sm:$0xff] %vm565_vm12, %v593_v19 }
 0x4c7 PF: > { %p1183_p10 = scmp.eq.s32.totalorder %s717_s24, 1  ;;  %s607_s16 = sshll.u32 %s1219_s5, 4  ;;  %s608_s16 = int_to_ptr.hbm [resolvable:$true] %s607_s16 }
 0x4c8   : > { %s1042_s17 = smov [#allocation10]   ;;  %s1043_s19 = smov 128  }
 0x4c9   : > { %s605_s18 = sshll.u32 %s1042_s17, 4  ;;  %s1044_s20 = smov 8   ;;  %s606_s18 = int_to_ptr.vmem [resolvable:$true] %s605_s18 }
 0x4ca   : > { %768 = dma.vmem_to_hbm [thread:$0]  (%p1183_p10), %s606_s18, 256, %s608_s16, [#allocation6], %s1043_s19, %s1043_s19, %s1044_s20  }
 0x4cb   : > { %s1045_s26 = smov [#allocation11]   ;;  %s624_s28 = sshll.u32 %s1220_s6, 4  ;;  %s625_s28 = int_to_ptr.hbm [resolvable:$true] %s624_s28 }
 0x4cc   : > { %s622_s24 = sshll.u32 %s1045_s26, 4  ;;  %s623_s24 = int_to_ptr.vmem [resolvable:$true] %s622_s24 }
 0x4cd   : > { %770 = dma.vmem_to_hbm [thread:$0]  (%p1183_p10), %s623_s24, 256, %s625_s28, [#allocation12], %s1043_s19, %s1043_s19, %s1044_s20  }
 0x4ce   : > { %1014 = dma.done.wait (%p1183_p10), [#allocation6], 256  }
 0x4cf   : > { %1016 = vsyncadd (%p1183_p10), [#allocation6], 4294967040 }
 0x4d0   : > { %1018 = dma.done.wait (%p1183_p10), [#allocation12], 256  }
 0x4d1   : > { %1020 = vsyncadd (%p1183_p10), [#allocation12], 4294967040 }
 0x4d2 PF: > { %s21_s23 = sadd.s32 1, %s1031_s23   ;;  %s1225_s21 = smov %s1027_s22 }
 0x4d3   : > { %p18_p11 = scmp.ge.s32.totalorder %s21_s23, 4   ;;  %s1226_s22 = smov %s1228_s9 }
 0x4d5   :  { %20 = sbr.rel (!%p18_p11) target bundleno = 5 (0x5), region = 108 }
 0x4da   :  { %646 = vsyncpa [#allocation5], 1 }
 0x4db   :  { %648 = vsyncpa [#allocation5 + $0x1], 1 }
 0x4dc   :  { %649 = vsyncpa [#allocation8], 1 }
 0x4dd   :  { %650 = vsyncpa [#allocation6], 1 }
 0x4de   :  { %652 = vsyncpa [#allocation6 + $0x1], 1 }
 0x4df   :  { %653 = vsyncpa [#allocation12], 1 }

</bundles_post_ra>
